<compile_context>
chip_gen: v7x
topology: tpu7x:2x2x1
jax: 0.10.0
libtpu: 0.0.40
codegen_flags: <defaults>
</compile_context>

<pallas_src>
import functools

import jax
import jax.numpy as jnp
from jax.experimental import pallas as pl
from jax.experimental.pallas import tpu as pltpu


# --------------------------- Pallas kernel ---------------------------------- #

def _soft_xent_kernel(x_ref, t_ref, loss_ref, *, n_total, tile_n, ragged):
    """One grid step: loss contribution of `tile_n` rows, accumulated in SMEM."""
    i = pl.program_id(0)

    @pl.when(i == 0)
    def _():
        loss_ref[0, 0] = jnp.float32(0.0)

    x = x_ref[...].astype(jnp.float32)            # (tile_n, C)
    t = t_ref[...].astype(jnp.float32)            # (tile_n, C)

    # numerically stable log_softmax over the class axis (torch dim=1)
    m = jnp.max(x, axis=-1, keepdims=True)
    shifted = x - m
    lse = jnp.log(jnp.sum(jnp.exp(shifted), axis=-1, keepdims=True))
    log_sm = shifted - lse                        # log_softmax(x, axis=-1)

    contrib = -log_sm * t
    if ragged:
        # mask rows past the true sample count (handles N % tile_n != 0)
        row = i * tile_n + jax.lax.broadcasted_iota(jnp.int32, x.shape, 0)
        contrib = jnp.where(row < n_total, contrib, 0.0)

    loss_ref[0, 0] += jnp.sum(contrib)

    @pl.when(i == pl.num_programs(0) - 1)
    def _():
        loss_ref[0, 0] = loss_ref[0, 0] * jnp.float32(1.0 / n_total)


# --------------------------- wrapper ----------------------------------------- #

def _pick_tile(n, c, itemsize=4, vmem_budget_bytes=8 * 1024 * 1024):
    """Sample-axis tile: full N if it fits, else the largest multiple of 8 that
    keeps (2 inputs x 2 pipeline buffers x tile_n x C) inside the VMEM budget."""
    per_row = 2 * 2 * c * itemsize                 # two inputs, double-buffered
    t = max(8, vmem_budget_bytes // per_row)
    if t >= n:
        return n                                   # full-extent block is always legal
    return max(8, (t // 8) * 8)                    # (8,128) sublane constraint


@functools.partial(jax.jit, static_argnames=("tile_n",))
def soft_cross_entropy(inputs, target, *, tile_n=None):
    """Pallas implementation of softCrossEntropy.forward(inputs, target)."""
    n, c = inputs.shape
    assert target.shape == (n, c)
    tn = tile_n if tile_n is not None else _pick_tile(n, c)
    tn = min(tn, n)
    grid = (pl.cdiv(n, tn),)
    ragged = (n % tn) != 0

    kernel = functools.partial(
        _soft_xent_kernel, n_total=n, tile_n=tn, ragged=ragged)
    loss2d = pl.pallas_call(
        kernel,
        out_shape=jax.ShapeDtypeStruct((1, 1), jnp.float32),
        grid=grid,
        in_specs=[
            pl.BlockSpec((tn, c), lambda i: (i, 0)),
            pl.BlockSpec((tn, c), lambda i: (i, 0)),
        ],
        # scalar loss lives in SMEM, resident across the whole (reduction) grid
        out_specs=pl.BlockSpec(memory_space=pltpu.MemorySpace.SMEM),
        compiler_params=pltpu.CompilerParams(
            dimension_semantics=("arbitrary",)),   # accumulation axis
    )(inputs, target)
    return loss2d[0, 0]


# --------------------------- demo / self-check -------------------------------- #

if __name__ == "__main__":
    key = jax.random.PRNGKey(0)
    k_in, k_tg = jax.random.split(key)

    N, C = 16, 32                                  # sample_num, class_num (small demo)
    inputs = jax.random.normal(k_in, (N, C), jnp.float32)          # predictions (logits)
    target = jax.nn.softmax(jax.random.normal(k_tg, (N, C)), -1)   # soft target labels

    # force a 2-step grid so the accumulate / masked-ragged path is exercised
    loss = soft_cross_entropy(inputs, target, tile_n=8)
    loss = jax.block_until_ready(loss)

    # pure-JAX reference of the torch module
    ref = jnp.sum(-jax.nn.log_softmax(inputs, axis=1) * target) / N

    assert loss.shape == ()
    assert bool(jnp.isfinite(loss))
    assert bool(jnp.abs(loss - ref) < 1e-4 * (1.0 + jnp.abs(ref))), (loss, ref)

    print("KERNEL_OK")
</pallas_src>

<mosaic_0001>
module attributes {stable_mosaic.version = 11 : i64} {
  func.func @_soft_xent_kernel(%arg0: i32, %arg1: memref<8x32xf32, #tpu.memory_space<vmem>>, %arg2: memref<8x32xf32, #tpu.memory_space<vmem>>, %arg3: memref<1x1xf32, #tpu.memory_space<smem>>) attributes {dimension_semantics = [#tpu.dimension_semantics<arbitrary>], iteration_bounds = array<i64: 2>, scalar_prefetch = 0 : i64, scratch_operands = 0 : i64, tpu.core_type = #tpu.core_type<tc>, window_params = [{transform_indices = @transform_0, window_bounds = array<i64: 8, 32>}, {transform_indices = @transform_1, window_bounds = array<i64: 8, 32>}, {transform_indices = @transform_2, window_bounds = array<i64: 1, 1>}]} {
    %c0_i32 = arith.constant 0 : i32
    %0 = arith.cmpi eq, %arg0, %c0_i32 : i32
    %1 = arith.extui %0 : i1 to i32
    %c0_i32_0 = arith.constant 0 : i32
    %2 = arith.cmpi ne, %1, %c0_i32_0 : i32
    scf.if %2 {
      %cst_12 = arith.constant 0.000000e+00 : f32
      %c0_13 = arith.constant 0 : index
      %c0_14 = arith.constant 0 : index
      %28 = memref.load %arg3[%c0_13, %c0_14] : memref<1x1xf32, #tpu.memory_space<smem>>
      memref.store %cst_12, %arg3[%c0_13, %c0_14] : memref<1x1xf32, #tpu.memory_space<smem>>
    } else {
    }
    %c0 = arith.constant 0 : index
    %c0_1 = arith.constant 0 : index
    %3 = vector.load %arg1[%c0, %c0_1] : memref<8x32xf32, #tpu.memory_space<vmem>>, vector<8x32xf32>
    %c0_2 = arith.constant 0 : index
    %c0_3 = arith.constant 0 : index
    %4 = vector.load %arg2[%c0_2, %c0_3] : memref<8x32xf32, #tpu.memory_space<vmem>>, vector<8x32xf32>
    %cst = arith.constant dense<0xFF800000> : vector<8xf32>
    %5 = vector.multi_reduction <maximumf>, %3, %cst [1] : vector<8x32xf32> to vector<8xf32>
    %6 = vector.shape_cast %5 : vector<8xf32> to vector<8x1xf32>
    %7 = vector.broadcast %6 : vector<8x1xf32> to vector<8x32xf32>
    %8 = arith.subf %3, %7 : vector<8x32xf32>
    %9 = math.exp %8 : vector<8x32xf32>
    %cst_4 = arith.constant dense<0.000000e+00> : vector<8xf32>
    %10 = vector.multi_reduction <add>, %9, %cst_4 [1] : vector<8x32xf32> to vector<8xf32>
    %11 = vector.shape_cast %10 : vector<8xf32> to vector<8x1xf32>
    %12 = math.log %11 : vector<8x1xf32>
    %13 = vector.broadcast %12 : vector<8x1xf32> to vector<8x32xf32>
    %14 = arith.subf %8, %13 : vector<8x32xf32>
    %cst_5 = arith.constant 0.000000e+00 : f32
    %15 = vector.broadcast %cst_5 : f32 to vector<8x32xf32>
    %16 = arith.subf %15, %14 : vector<8x32xf32>
    %17 = arith.mulf %16, %4 : vector<8x32xf32>
    %c0_6 = arith.constant 0 : index
    %c0_7 = arith.constant 0 : index
    %18 = memref.load %arg3[%c0_6, %c0_7] : memref<1x1xf32, #tpu.memory_space<smem>>
    %19 = vector.shape_cast %17 : vector<8x32xf32> to vector<1x8x32xf32>
    %cst_8 = arith.constant dense<0.000000e+00> : vector<1xf32>
    %20 = vector.multi_reduction <add>, %19, %cst_8 [1, 2] : vector<1x8x32xf32> to vector<1xf32>
    %21 = vector.shape_cast %20 : vector<1xf32> to vector<1x1x1xf32>
    %22 = vector.extract %21[0, 0, 0] : f32 from vector<1x1x1xf32>
    %23 = arith.addf %18, %22 : f32
    %c0_9 = arith.constant 0 : index
    %c0_10 = arith.constant 0 : index
    %24 = memref.load %arg3[%c0_9, %c0_10] : memref<1x1xf32, #tpu.memory_space<smem>>
    memref.store %23, %arg3[%c0_9, %c0_10] : memref<1x1xf32, #tpu.memory_space<smem>>
    %c1_i32 = arith.constant 1 : i32
    %25 = arith.cmpi eq, %arg0, %c1_i32 : i32
    %26 = arith.extui %25 : i1 to i32
    %c0_i32_11 = arith.constant 0 : i32
    %27 = arith.cmpi ne, %26, %c0_i32_11 : i32
    scf.if %27 {
      %c0_12 = arith.constant 0 : index
      %c0_13 = arith.constant 0 : index
      %28 = memref.load %arg3[%c0_12, %c0_13] : memref<1x1xf32, #tpu.memory_space<smem>>
      %cst_14 = arith.constant 6.250000e-02 : f32
      %29 = arith.mulf %28, %cst_14 : f32
      %c0_15 = arith.constant 0 : index
      %c0_16 = arith.constant 0 : index
      %30 = memref.load %arg3[%c0_15, %c0_16] : memref<1x1xf32, #tpu.memory_space<smem>>
      memref.store %29, %arg3[%c0_15, %c0_16] : memref<1x1xf32, #tpu.memory_space<smem>>
    } else {
    }
    return
  }
  func.func @transform_0(%arg0: i32) -> (i32, i32) {
    %c0_i32 = arith.constant 0 : i32
    %c0_i32_0 = arith.constant 0 : i32
    return %arg0, %c0_i32 : i32, i32
  }
  func.func @transform_1(%arg0: i32) -> (i32, i32) {
    %c0_i32 = arith.constant 0 : i32
    %c0_i32_0 = arith.constant 0 : i32
    return %arg0, %c0_i32 : i32, i32
  }
  func.func @transform_2(%arg0: i32) -> (i32, i32) {
    %c0_i32 = arith.constant 0 : i32
    %c0_i32_0 = arith.constant 0 : i32
    %c0_i32_1 = arith.constant 0 : i32
    return %c0_i32, %c0_i32_0 : i32, i32
  }
}

</mosaic_0001>

<bundles_post_ra>
// kernel: soft_cross_entropy.1
= control target key start
LH: loop header
LB: loop body
LE: loop exit
PB: predicated region body
PF: predicated region fallthrough
CT: control target
= control target key end

     0   :  { %7 = vsyncpa [#allocation3], 0  ;;  %s709_s0 = inlined_call_operand.hbm [shape: f32[16,32], index: 0, kind: input, shape index: {}]   ;;  %s710_s1 = inlined_call_operand.hbm [shape: f32[16,32], index: 1, kind: input, shape index: {}]   ;;  %s711_s2 = inlined_call_operand.hbm [shape: f32[1,1], index: 2, kind: output, shape index: {}]  }
   0x1   :  { %9 = vsyncpa [#allocation3 + $0x1], 0 }
   0x2   :  { %10 = vsyncpa [#allocation6], 0 }
   0x3   :  { %12 = vsyncpa [#allocation6 + $0x1], 0 }
   0x4   :  { %13 = vsyncpa [#allocation4], 0  ;;  %s522_s9 = smov 0   ;;  %s524_s10 = smov 0  }
   0x5   :  { %s526_s11 = smov 0   ;;  %s528_s12 = smov 0  }
   0x6 LB: > { %s307_s13 = sadd.s32 4294967295, %s501_s12   ;;  %s542_s14 = sadd.s32 1, %s501_s12   ;;  %s501_s12 = sphi %s528_s12, %s727_s12   ;;  %s497_s11 = sphi %s526_s11, %s726_s11   ;;  %s493_s10 = sphi %s524_s10, %s725_s10   ;;  %s489_s9 = sphi %s522_s9, %s724_s9  }
   0x7   : > { %s23_s15 = ssub.s32 %s501_s12, %s542_s14  ;;  %s26_s16 = sadd.s32 1, %s497_s11 }
   0x8   : > { %p24_p0 = scmp.eq.s32.totalorder %s23_s15, 0  ;;  %p33_p1 = scmp.ne.s32.totalorder %s497_s11, %s493_s10 }
   0x9   : > { %p34_p2 = scmp.eq.s32.totalorder %s501_s12, 0  ;;  %p39_p3 = scmp.ne.s32.totalorder %s493_s10, %s489_s9 }
   0xa   : > { %s552_s17 = scalar_select %p24_p0, %s497_s11, %s26_s16  }
   0xb   : > { %p35_p4 = por %p34_p2, %p33_p1  ;;  %p556_p5 = scmp.eq.s32.totalorder %s307_s13, 0 }
   0xc   : > { %p344_p6 = scmp.lt.s32.totalorder %s501_s12, 2  ;;  %s568_s20 = sand.u32 1, %s497_s11  }
   0xd   : > { %s714_s18 = scalar_select %p556_p5, 1, 0 }
   0xe   : > { %p563_p7 = por %p556_p5, %p39_p3  ;;  %s310_s21 = sshll.u32 %s568_s20, 3 }
   0xf   : > { %s311_s22 = sshll.u32 %s501_s12, 7  ;;  %s114_s26 = scalar_lea.vmem [#allocation2], %s310_s21 }
  0x10   : > { %s715_s19 = scalar_select %p563_p7, 1, 0 }
  0x11   : > { %s577_s25 = scalar_lea.hbm %s709_s0, %s311_s22  ;;  %s121_s27 = sshll.u32 %s114_s26, 4  ;;  %s581_s27 = int_to_ptr.vmem [resolvable:$true] %s121_s27 }
  0x12   : > { %p583_p8 = pnand %p344_p6, %p35_p4  ;;  %s111_s29 = scalar_lea.sflag [#allocation3], %s568_s20 }
  0x13   : > { %s387_s30 = scalar_lea.hbm %s577_s25, 128  ;;  %s392_s5 = scalar_lea.hbm %s709_s0, 256 }
  0x14   : > { %p388_p11 = scmp.ne.s32.totalorder %s577_s25, %s387_s30  ;;  %p389_p12 = pneg %p583_p8 }
  0x15   : > { %p393_p1 = scmp.lt.u32.totalorder %s577_s25, %s709_s0  ;;  %p394_p2 = scmp.lt.u32.totalorder %s392_s5, %s387_s30 }
  0x16   : > { %p390_p13 = pnand %p389_p12, %p388_p11  ;;  %p396_p4 = scmp.lt.u32.totalorder %s387_s30, %s577_s25 }
  0x17   : > { %p395_p3 = por %p394_p2, %p393_p1 }
  0x18   : > { %p391_p0 = pneg %p390_p13 }
  0x19   : > { %p397_p6 = por %p396_p4, %p395_p3 }
  0x1b   : > { %p398_p9 = pnand %p397_p6, %p391_p0 }
  0x1d   : > { %401 = shalt.err (!%p398_p9)
}
  0x1e   : > { %s402_s8 = scalar_lea.vmem %s581_s27, 128  ;;  %s503_s9 = smov [#allocation2]  }
  0x1f   : > { %p403_p11 = scmp.ne.s32.totalorder %s581_s27, %s402_s8  ;;  %s407_s15 = sshll.u32 %s503_s9, 4  ;;  %s408_s15 = int_to_ptr.vmem [resolvable:$false] %s407_s15 }
  0x20   : > { %s409_s16 = scalar_lea.vmem %s408_s15, 256  ;;  %p410_p5 = scmp.lt.s32.totalorder %s581_s27, %s408_s15 }
  0x21   : > { %p405_p13 = pnand %p403_p11, %p389_p12  ;;  %p411_p1 = scmp.lt.s32.totalorder %s409_s16, %s402_s8 }
  0x23   : > { %p406_p10 = pneg %p405_p13  ;;  %p412_p2 = por %p411_p1, %p410_p5 }
  0x25   : > { %p413_p3 = pnand %p412_p2, %p406_p10 }
  0x27   : > { %416 = shalt.err (!%p413_p3)
}
  0x28   : > { %340 = dma.hbm_to_vmem [thread:$0]  (!%p583_p8), %s577_s25, 128, %s581_s27, %s111_s29  }
  0x29   : > { %p717_p9 = scmp.lt.s32.totalorder %s501_s12, 3  ;;  %p718_p0 = scmp.ge.s32.totalorder %s501_s12, 1 }
  0x2a   : > { %s628_s30 = scalar_lea.hbm %s710_s1, %s311_s22  ;;  %s132_s3 = scalar_lea.vmem [#allocation5], %s310_s21 }
  0x2b   : > { %p619_p4 = pnand %p718_p0, %p717_p9  ;;  %s139_s4 = sshll.u32 %s132_s3, 4  ;;  %s140_s4 = int_to_ptr.vmem [resolvable:$true] %s139_s4 }
  0x2c   : > { %s129_s25 = scalar_lea.sflag [#allocation6], %s568_s20  ;;  %s417_s27 = scalar_lea.hbm %s628_s30, 128 }
  0x2d   : > { %s719_s23 = scalar_select %p619_p4, 1, 0 }
  0x2e   : > { %p418_p5 = scmp.ne.s32.totalorder %s628_s30, %s417_s27  ;;  %s422_s22 = scalar_lea.hbm %s710_s1, 256 }
  0x2f   : > { %p423_p11 = scmp.lt.u32.totalorder %s628_s30, %s710_s1  ;;  %p424_p13 = scmp.lt.u32.totalorder %s422_s22, %s417_s27 }
  0x30   : > { %p420_p10 = pnand %p418_p5, %p389_p12  ;;  %p426_p2 = scmp.lt.u32.totalorder %s417_s27, %s628_s30 }
  0x31   : > { %p425_p1 = por %p424_p13, %p423_p11 }
  0x32   : > { %p421_p6 = pneg %p420_p10 }
  0x33   : > { %p427_p3 = por %p426_p2, %p425_p1 }
  0x35   : > { %p428_p9 = pnand %p427_p3, %p421_p6 }
  0x37   : > { %431 = shalt.err (!%p428_p9)
}
  0x38   : > { %s432_s20 = scalar_lea.vmem %s140_s4, 128  ;;  %s504_s21 = smov [#allocation5]  }
  0x39   : > { %p433_p0 = scmp.ne.s32.totalorder %s140_s4, %s432_s20  ;;  %s437_s8 = sshll.u32 %s504_s21, 4  ;;  %s438_s8 = int_to_ptr.vmem [resolvable:$false] %s437_s8 }
  0x3a   : > { %s439_s9 = scalar_lea.vmem %s438_s8, 256  ;;  %p440_p7 = scmp.lt.s32.totalorder %s140_s4, %s438_s8 }
  0x3b   : > { %p435_p5 = pnand %p433_p0, %p389_p12  ;;  %p441_p4 = scmp.lt.s32.totalorder %s439_s9, %s432_s20 }
  0x3d   : > { %p436_p10 = pneg %p435_p5  ;;  %p442_p11 = por %p441_p4, %p440_p7 }
  0x3f   : > { %p443_p13 = pnand %p442_p11, %p436_p10 }
  0x41   : > { %446 = shalt.err (!%p443_p13)
}
  0x42   : > { %343 = dma.hbm_to_vmem [thread:$0]  (!%p583_p8), %s628_s30, 128, %s140_s4, %s129_s25  }
  0x43   : > { %p720_p6 = scmp.ne.s32.totalorder %s719_s23, 0 }
  0x44   : > { %s150_s15 = sand.u32 (!%p720_p6), 1, %s493_s10   ;;  %p721_p12 = scmp.ne.s32.totalorder (!%p720_p6), %s715_s19, 0 }
  0x45   : > { %148 = sbr.rel (%p720_p6) target bundleno = 616 (0x268), region = 28  ;;  %s315_s16 = sshll.u32 (!%p720_p6), %s150_s15, 3 }
  0x46   : > { %s151_s24 = scalar_lea.sflag (!%p720_p6), [#allocation3], %s150_s15  ;;  %s154_s26 = scalar_lea.vmem (!%p720_p6), [#allocation2], %s315_s16 }
  0x4c   : > { %476 = dma.done.wait (%p721_p12), %s151_s24, 128  }
  0x4d   : > { %478 = vsyncadd (%p721_p12), %s151_s24, 4294967168  ;;  %s160_s3 = scalar_lea.sflag [#allocation6], %s150_s15  ;;  %s163_s27 = scalar_lea.vmem [#allocation5], %s315_s16 }
  0x4e   : > { %480 = dma.done.wait (%p721_p12), %s160_s3, 128  }
  0x4f   : > { %482 = vsyncadd (%p721_p12), %s160_s3, 4294967168  ;;  %vm192_vm0 = vcmask 261120   ;;  %v190_v0 = vld [vmem:[%s154_s26] sm:$0xff]  ;;  %v191_v11 = vld [vmem:[%s163_s27] sm:$0xff]  ;;  %s505_s19 = smov 0.0   ;;  %p722_p7 = scmp.ne.s32.totalorder %s714_s18, 0 }
  0x50   : > { %v193_v1 = vsel %vm192_vm0, %v190_v0, -inf  ;;  %p670_p8 = scmp.eq.s32.totalorder %s307_s13, 1  ;;  %s447_s5 = scalar_lea.hbm %s711_s2, 16 }
  0x51   : > { %194 = vmax.xlane.f32.xlu0 %v193_v1  ;;  %330 = sst [smem:[#allocation7]] (%p722_p7), %s505_s19  ;;  %p448_p4 = scmp.ne.s32.totalorder %s711_s2, %s447_s5 }
  0x52   : > { %s207_s28 = sld [smem:[#allocation7]]  ;;  %p453_p3 = scmp.lt.u32.totalorder %s447_s5, %s711_s2 }
  0x53   : > { %p449_p1 = pnand %p448_p4, %p670_p8 }
  0x55   : > { %p450_p2 = pneg %p449_p1 }
  0x57   : > { %p455_p9 = pnand %p453_p3, %p450_p2 }
  0xde   : > { %v195_v2 = vpop.xlane.xlu0 %194 }
  0xdf   : > { %v196_v3 = vsub.f32 %v190_v0, %v195_v2 }
  0xe1   : > { %v197_v4 = vmul.f32 1.442695, %v196_v3 }
  0xe3   : > { %383 = vpow2.f32 %v197_v4 }
  0xed   : > { %v384_v5 = vpop.eup %383 }
  0xee   : > { %v199_v6 = vsel %vm192_vm0, %v384_v5, 0.0 }
  0xef   : > { %200 = vadd.xlane.f32.xlu0 %v199_v6 }
 0x17c   : > { %v201_v7 = vpop.xlane.xlu0 %200 }
 0x17d   : > { %385 = vlog2.f32 %v201_v7 }
 0x187   : > { %v386_v8 = vpop.eup %385 }
 0x188   : > { %v203_v9 = vmul.f32 0.6931472, %v386_v8 }
 0x18a   : > { %v204_v10 = vsub.f32 %v196_v3, %v203_v9 }
 0x18c   : > { %v205_v12 = vsub.f32 0.0, %v204_v10 }
 0x18e   : > { %v206_v13 = vmul.f32 %v205_v12, %v191_v11 }
 0x190   : > { %v208_v14 = vsel %vm192_vm0, %v206_v13, 0.0 }
 0x191   : > { %209 = vadd.xlane.f32.xlu1 %v208_v14 }
 0x21e   : > { %v210_v15 = vpop.xlane.xlu1 %209 }
 0x21f   : > { %v211_v16 = vrot.slane %v210_v15, 4 }
 0x221   : > { %v212_v17 = vadd.f32 %v211_v16, %v210_v15 }
 0x223   : > { %v213_v18 = vrot.slane %v212_v17, 2 }
 0x225   : > { %v214_v19 = vadd.f32 %v213_v18, %v212_v17 }
 0x227   : > { %v215_v20 = vrot.slane %v214_v19, 1 }
 0x229   : > { %v216_v21 = vadd.f32 %v215_v20, %v214_v19 }
 0x22b   : > { %323 = vpush %v216_v21 }
 0x25c   : > { %s324_s23 = spop %323 }
 0x25d   : > { %s218_s30 = sadd.f32 %s324_s23, %s207_s28 }
 0x25f   : > { %220 = sst [smem:[#allocation7]] %s218_s30  ;;  %s226_s18 = smul.f32 0.0625, %s218_s30 }
 0x261   : > { %332 = sst [smem:[#allocation7]] (%p670_p8), %s226_s18 }
 0x262   : > { %458 = shalt.err (!%p455_p9)
}
 0x263   : > { %s506_s7 = smov [#allocation7]  }
 0x264   : > { %334 = dma.smem_to_hbm (%p670_p8), %s506_s7, 16, %s711_s2, [#allocation4]  }
 0x265   : > { %484 = dma.done.wait (%p670_p8), [#allocation4], 16  }
 0x266   : > { %486 = vsyncadd (%p670_p8), [#allocation4], 4294967280 }
 0x267   : > { %241 = sfence }
 0x268 PF: > { %p16_p0 = scmp.ge.s32.totalorder %s542_s14, 4   ;;  %s724_s9 = smov %s493_s10 }
 0x269   : > { %s725_s10 = smov %s497_s11  ;;  %s726_s11 = smov %s552_s17 }
 0x26a   : > { %s727_s12 = smov %s542_s14  ;;  %18 = sbr.rel (!%p16_p0) target bundleno = 6 (0x6), region = 88 }
 0x271   :  { %247 = vsyncpa [#allocation3], 1 }
 0x272   :  { %249 = vsyncpa [#allocation3 + $0x1], 1 }
 0x273   :  { %250 = vsyncpa [#allocation6], 1 }
 0x274   :  { %252 = vsyncpa [#allocation6 + $0x1], 1 }
 0x275   :  { %253 = vsyncpa [#allocation4], 1 }
 0x276   :  { %255 = vsyncpa [#allocation4 + $0x1], 1 }

</bundles_post_ra>
